<compile_context>
chip_gen: v6e
topology: v6e:2x2x1
jax: 0.10.0
libtpu: 0.0.40
codegen_flags: <defaults>
</compile_context>

<pallas_src>
import jax
import jax.numpy as jnp
import numpy as np
from jax.experimental import pallas as pl
from jax.experimental.pallas import tpu as pltpu

_LANE = 128
_MAX_TILE = 2048  # rows; ~6-10 MB peak VMEM at hidden<=128 -> fits v5e's 16 MiB default


def _round_up(x, m):
    return ((x + m - 1) // m) * m


def _num_tensorcores():
    """Best-effort detection of TensorCores per chip (v7x has 2)."""
    try:
        kind = jax.devices()[0].device_kind.lower()
    except Exception:
        return 1
    return 2 if ("v7" in kind or "7x" in kind) else 1


def _choose_block_batch(B, num_tc):
    """Batch tile (multiple of 8).

    Single TensorCore (v5e/v6e): one big tile (up to _MAX_TILE rows) — the grid
    buys nothing, so minimize per-step overhead.
    Two TensorCores (v7x): keep the grid count even so the "parallel" axis
    splits evenly across both cores.
    """
    B8 = _round_up(max(B, 8), 8)
    if num_tc >= 2 and B8 > 8:
        target_grid = max(2, 2 * pl.cdiv(B8, 2 * _MAX_TILE))
        return min(_MAX_TILE, _round_up(pl.cdiv(B8, target_grid), 8))
    if B8 <= _MAX_TILE:
        return B8
    return _MAX_TILE


def _make_rnd_kernel(n_pred, n_tgt, h0_pred_pad, rep_pad):
    """Fused kernel: shared layer-0 matmul, then both MLP chains, one output slab."""

    def _chain(h, wb, n_layers):
        for i in range(n_layers):
            w = wb[2 * i][...]          # bf16 [in_pad, out_pad]
            b = wb[2 * i + 1][...]      # f32  [1, out_pad]
            h = jnp.dot(h.astype(w.dtype), w,
                        preferred_element_type=jnp.float32) + b
            if i < n_layers - 1:
                h = jnp.maximum(h, 0.0)  # ReLU on all but final layer (f32)
        return h

    def kernel(x_ref, w0_ref, b0_ref, *refs):
        out_ref = refs[-1]
        wb = refs[:-1]
        pred_wb = wb[: 2 * (n_pred - 1)]
        tgt_wb = wb[2 * (n_pred - 1):]

        # Fused first layer: x (bf16) @ [W0_pred | W0_tgt]  -> [tile, 2*H_pad].
        h0 = jnp.dot(x_ref[...], w0_ref[...],
                     preferred_element_type=jnp.float32) + b0_ref[...]
        h0 = jnp.maximum(h0, 0.0)  # both nets have ReLU after layer 0 (>=2 layers)

        p = _chain(h0[:, :h0_pred_pad], pred_wb, n_pred - 1)
        t = _chain(h0[:, h0_pred_pad:], tgt_wb, n_tgt - 1)

        # One bf16 output slab: pred in [:rep_pad], target in [rep_pad:].
        out_ref[:, :rep_pad] = p.astype(out_ref.dtype)
        out_ref[:, rep_pad:] = t.astype(out_ref.dtype)

    return kernel


def _pad_wb(w, b, pad_in, param_dtype=jnp.bfloat16):
    """Zero-pad out-dim (and optionally in-dim) to multiples of 128; weights to
    bf16 for the MXU, biases stay f32 for the f32 epilogue."""
    din, dout = w.shape
    din_p = _round_up(din, _LANE) if pad_in else din
    dout_p = _round_up(dout, _LANE)
    wp = jnp.pad(w, ((0, din_p - din), (0, dout_p - dout))).astype(param_dtype)
    bp = jnp.pad(b, ((0, 0), (0, dout_p - dout))).astype(jnp.float32)
    return wp, bp


@jax.jit
def rnd_forward(obs, pred_weights, pred_biases, tgt_weights, tgt_biases):
    """RND.forward: returns (predict_feature, target_feature), both f32."""
    B, obs_dim = obs.shape
    n_pred, n_tgt = len(pred_weights), len(tgt_weights)
    assert n_pred >= 2 and n_tgt >= 2, "fused layer-0 ReLU assumes >= 2 layers per net"

    rep_size = pred_weights[-1].shape[1]
    assert tgt_weights[-1].shape[1] == rep_size
    rep_pad = _round_up(rep_size, _LANE)

    # obs kept at native feature width (no lane padding on the input side) and
    # handed to the kernel in bf16 (halves the obs HBM read).
    obs_bf16 = obs.astype(jnp.bfloat16)

    # Fuse the two networks' first layers along the output axis.
    w0p, b0p = _pad_wb(pred_weights[0], pred_biases[0], pad_in=False)
    w0t, b0t = _pad_wb(tgt_weights[0], tgt_biases[0], pad_in=False)
    h0_pred_pad = w0p.shape[1]
    w0cat = jnp.concatenate([w0p, w0t], axis=1)   # [obs_dim, H_pad_pred + H_pad_tgt]
    b0cat = jnp.concatenate([b0p, b0t], axis=1)

    pred_wb = [_pad_wb(w, b, pad_in=True)
               for w, b in zip(pred_weights[1:], pred_biases[1:])]
    tgt_wb = [_pad_wb(w, b, pad_in=True)
              for w, b in zip(tgt_weights[1:], tgt_biases[1:])]

    # Generation-aware batch tiling; pad B to a multiple of the tile.
    tile = _choose_block_batch(B, _num_tensorcores())
    grid_b = pl.cdiv(B, tile)
    B_pad = grid_b * tile
    if B_pad != B:
        obs_bf16 = jnp.pad(obs_bf16, ((0, B_pad - B), (0, 0)))

    vmem_spec = pl.BlockSpec(memory_space=pltpu.MemorySpace.VMEM)
    in_specs = [pl.BlockSpec((tile, obs_dim), lambda i: (i, 0)), vmem_spec, vmem_spec]
    args = [obs_bf16, w0cat, b0cat]
    for w, b in pred_wb + tgt_wb:
        in_specs += [vmem_spec, vmem_spec]
        args += [w, b]

    out = pl.pallas_call(
        _make_rnd_kernel(n_pred, n_tgt, h0_pred_pad, rep_pad),
        out_shape=jax.ShapeDtypeStruct((B_pad, 2 * rep_pad), jnp.bfloat16),
        grid=(grid_b,),
        in_specs=in_specs,
        out_specs=pl.BlockSpec((tile, 2 * rep_pad), lambda i: (i, 0)),
        compiler_params=pltpu.CompilerParams(
            dimension_semantics=("parallel",),
            vmem_limit_bytes=32 * 1024 * 1024),
    )(*args)

    predict_feature = out[:B, :rep_size].astype(jnp.float32)
    target_feature = out[:B, rep_pad:rep_pad + rep_size].astype(jnp.float32)
    return predict_feature, target_feature


def _orthogonal_linear_params(key, in_dim, out_dim, gain):
    """Orthogonal weight (gain=sqrt(2)) + zero bias, matching PyTorch init_."""
    w_oi = jax.nn.initializers.orthogonal(scale=gain)(
        key, (out_dim, in_dim), jnp.float32)
    w = jnp.transpose(w_oi)                  # [in, out] so that y = x @ W
    b = jnp.zeros((1, out_dim), dtype=jnp.float32)
    return w, b


def build_mlp_params(key, layer_dims, gain=float(np.sqrt(2))):
    """layer_dims = [d0, d1, ..., dL]; returns L weights/biases."""
    weights, biases = [], []
    keys = jax.random.split(key, len(layer_dims) - 1)
    for k, din, dout in zip(keys, layer_dims[:-1], layer_dims[1:]):
        w, b = _orthogonal_linear_params(k, din, dout, gain)
        weights.append(w)
        biases.append(b)
    return weights, biases


if __name__ == "__main__":
    # Synthetic "args": hidden_size, rnd_rep_size, layer_N; flat (1-D) obs space.
    hidden_size = 32
    rep_size = 16
    layer_N = 1
    obs_dim = 24
    batch = 50   # deliberately not a multiple of the batch tile (exercises padding)

    key = jax.random.PRNGKey(0)
    k_obs, k_pred, k_tgt = jax.random.split(key, 3)
    obs = jax.random.normal(k_obs, (batch, obs_dim), dtype=jnp.float32)

    # Predictor: MLPLayer(obs, H, layer_N + 2) -> (layer_N + 3) Linear+ReLU,
    # then final Linear(H, rep) with no activation.
    pred_dims = [obs_dim] + [hidden_size] * (layer_N + 3) + [rep_size]
    # Target: MLPLayer(obs, H, layer_N) -> (layer_N + 1) Linear+ReLU, then
    # Linear(H, rep). (Frozen in PyTorch; irrelevant for the forward pass.)
    tgt_dims = [obs_dim] + [hidden_size] * (layer_N + 1) + [rep_size]
    # TODO(synk): MLPLayer variants with tanh / use_feature_normalization are not
    # modeled; this matches use_ReLU=True, use_layernorm=False as in the spec.

    pred_w, pred_b = build_mlp_params(k_pred, pred_dims)
    tgt_w, tgt_b = build_mlp_params(k_tgt, tgt_dims)

    predict_feature, target_feature = rnd_forward(
        obs, tuple(pred_w), tuple(pred_b), tuple(tgt_w), tuple(tgt_b))
    jax.block_until_ready((predict_feature, target_feature))

    # Pure-JAX reference with the same bf16 matmul operands / f32 accumulation.
    def ref_mlp(x, ws, bs):
        h = x.astype(jnp.bfloat16)
        for i, (w, b) in enumerate(zip(ws, bs)):
            h = jnp.dot(h.astype(jnp.bfloat16), w.astype(jnp.bfloat16),
                        preferred_element_type=jnp.float32) + b
            if i < len(ws) - 1:
                h = jnp.maximum(h, 0.0)
        return h

    ref_pred = ref_mlp(obs, pred_w, pred_b)
    ref_tgt = ref_mlp(obs, tgt_w, tgt_b)
    np.testing.assert_allclose(np.asarray(predict_feature), np.asarray(ref_pred),
                               rtol=2e-2, atol=2e-2)
    np.testing.assert_allclose(np.asarray(target_feature), np.asarray(ref_tgt),
                               rtol=2e-2, atol=2e-2)

    assert predict_feature.shape == (batch, rep_size)
    assert target_feature.shape == (batch, rep_size)
    print("KERNEL_OK")
</pallas_src>

<mosaic_0001>
module attributes {stable_mosaic.version = 11 : i64} {
  func.func @kernel(%arg0: i32, %arg1: memref<56x24xbf16, #tpu.memory_space<vmem>>, %arg2: memref<24x256xbf16, #tpu.memory_space<vmem>>, %arg3: memref<1x256xf32, #tpu.memory_space<vmem>>, %arg4: memref<128x128xbf16, #tpu.memory_space<vmem>>, %arg5: memref<1x128xf32, #tpu.memory_space<vmem>>, %arg6: memref<128x128xbf16, #tpu.memory_space<vmem>>, %arg7: memref<1x128xf32, #tpu.memory_space<vmem>>, %arg8: memref<128x128xbf16, #tpu.memory_space<vmem>>, %arg9: memref<1x128xf32, #tpu.memory_space<vmem>>, %arg10: memref<128x128xbf16, #tpu.memory_space<vmem>>, %arg11: memref<1x128xf32, #tpu.memory_space<vmem>>, %arg12: memref<128x128xbf16, #tpu.memory_space<vmem>>, %arg13: memref<1x128xf32, #tpu.memory_space<vmem>>, %arg14: memref<128x128xbf16, #tpu.memory_space<vmem>>, %arg15: memref<1x128xf32, #tpu.memory_space<vmem>>, %arg16: memref<56x256xbf16, #tpu.memory_space<vmem>>) attributes {dimension_semantics = [#tpu.dimension_semantics<parallel>], iteration_bounds = array<i64: 1>, scalar_prefetch = 0 : i64, scratch_operands = 0 : i64, tpu.core_type = #tpu.core_type<tc>, window_params = [{transform_indices = @transform_0, window_bounds = array<i64: 56, 24>}, {pipeline_mode = #tpu.pipeline_mode<synchronous>, transform_indices = @transform_1, window_bounds = array<i64: 24, 256>}, {pipeline_mode = #tpu.pipeline_mode<synchronous>, transform_indices = @transform_2, window_bounds = array<i64: 1, 256>}, {pipeline_mode = #tpu.pipeline_mode<synchronous>, transform_indices = @transform_3, window_bounds = array<i64: 128, 128>}, {pipeline_mode = #tpu.pipeline_mode<synchronous>, transform_indices = @transform_4, window_bounds = array<i64: 1, 128>}, {pipeline_mode = #tpu.pipeline_mode<synchronous>, transform_indices = @transform_5, window_bounds = array<i64: 128, 128>}, {pipeline_mode = #tpu.pipeline_mode<synchronous>, transform_indices = @transform_6, window_bounds = array<i64: 1, 128>}, {pipeline_mode = #tpu.pipeline_mode<synchronous>, transform_indices = @transform_7, window_bounds = array<i64: 128, 128>}, {pipeline_mode = #tpu.pipeline_mode<synchronous>, transform_indices = @transform_8, window_bounds = array<i64: 1, 128>}, {pipeline_mode = #tpu.pipeline_mode<synchronous>, transform_indices = @transform_9, window_bounds = array<i64: 128, 128>}, {pipeline_mode = #tpu.pipeline_mode<synchronous>, transform_indices = @transform_10, window_bounds = array<i64: 1, 128>}, {pipeline_mode = #tpu.pipeline_mode<synchronous>, transform_indices = @transform_11, window_bounds = array<i64: 128, 128>}, {pipeline_mode = #tpu.pipeline_mode<synchronous>, transform_indices = @transform_12, window_bounds = array<i64: 1, 128>}, {pipeline_mode = #tpu.pipeline_mode<synchronous>, transform_indices = @transform_13, window_bounds = array<i64: 128, 128>}, {pipeline_mode = #tpu.pipeline_mode<synchronous>, transform_indices = @transform_14, window_bounds = array<i64: 1, 128>}, {transform_indices = @transform_15, window_bounds = array<i64: 56, 256>}]} {
    %c0 = arith.constant 0 : index
    %c0_0 = arith.constant 0 : index
    %0 = vector.load %arg1[%c0, %c0_0] : memref<56x24xbf16, #tpu.memory_space<vmem>>, vector<56x24xbf16>
    %c0_1 = arith.constant 0 : index
    %c0_2 = arith.constant 0 : index
    %1 = vector.load %arg2[%c0_1, %c0_2] : memref<24x256xbf16, #tpu.memory_space<vmem>>, vector<24x256xbf16>
    %cst = arith.constant dense<0.000000e+00> : vector<56x256xf32>
    %2 = tpu.matmul %0, %1, %cst {dimension_numbers = #tpu.dot_dimension_numbers<[1], [0], [0], [1], [0, 0, 1, 1], [], []>} : vector<56x24xbf16>, vector<24x256xbf16>, vector<56x256xf32> -> vector<56x256xf32>
    %c0_3 = arith.constant 0 : index
    %c0_4 = arith.constant 0 : index
    %3 = vector.load %arg3[%c0_3, %c0_4] : memref<1x256xf32, #tpu.memory_space<vmem>>, vector<1x256xf32>
    %4 = vector.broadcast %3 : vector<1x256xf32> to vector<56x256xf32>
    %5 = arith.addf %2, %4 : vector<56x256xf32>
    %cst_5 = arith.constant 0.000000e+00 : f32
    %6 = vector.broadcast %cst_5 : f32 to vector<56x256xf32>
    %7 = arith.maximumf %5, %6 : vector<56x256xf32>
    %8 = vector.extract_strided_slice %7 {offsets = [0, 0], sizes = [56, 128], strides = [1, 1]} : vector<56x256xf32> to vector<56x128xf32>
    %c0_6 = arith.constant 0 : index
    %c0_7 = arith.constant 0 : index
    %9 = vector.load %arg4[%c0_6, %c0_7] : memref<128x128xbf16, #tpu.memory_space<vmem>>, vector<128x128xbf16>
    %c0_8 = arith.constant 0 : index
    %c0_9 = arith.constant 0 : index
    %10 = vector.load %arg5[%c0_8, %c0_9] : memref<1x128xf32, #tpu.memory_space<vmem>>, vector<1x128xf32>
    %11 = arith.truncf %8 : vector<56x128xf32> to vector<56x128xbf16>
    %cst_10 = arith.constant dense<0.000000e+00> : vector<56x128xf32>
    %12 = tpu.matmul %11, %9, %cst_10 {dimension_numbers = #tpu.dot_dimension_numbers<[1], [0], [0], [1], [0, 0, 1, 1], [], []>} : vector<56x128xbf16>, vector<128x128xbf16>, vector<56x128xf32> -> vector<56x128xf32>
    %13 = vector.broadcast %10 : vector<1x128xf32> to vector<56x128xf32>
    %14 = arith.addf %12, %13 : vector<56x128xf32>
    %cst_11 = arith.constant 0.000000e+00 : f32
    %15 = vector.broadcast %cst_11 : f32 to vector<56x128xf32>
    %16 = arith.maximumf %14, %15 : vector<56x128xf32>
    %c0_12 = arith.constant 0 : index
    %c0_13 = arith.constant 0 : index
    %17 = vector.load %arg6[%c0_12, %c0_13] : memref<128x128xbf16, #tpu.memory_space<vmem>>, vector<128x128xbf16>
    %c0_14 = arith.constant 0 : index
    %c0_15 = arith.constant 0 : index
    %18 = vector.load %arg7[%c0_14, %c0_15] : memref<1x128xf32, #tpu.memory_space<vmem>>, vector<1x128xf32>
    %19 = arith.truncf %16 : vector<56x128xf32> to vector<56x128xbf16>
    %cst_16 = arith.constant dense<0.000000e+00> : vector<56x128xf32>
    %20 = tpu.matmul %19, %17, %cst_16 {dimension_numbers = #tpu.dot_dimension_numbers<[1], [0], [0], [1], [0, 0, 1, 1], [], []>} : vector<56x128xbf16>, vector<128x128xbf16>, vector<56x128xf32> -> vector<56x128xf32>
    %21 = vector.broadcast %18 : vector<1x128xf32> to vector<56x128xf32>
    %22 = arith.addf %20, %21 : vector<56x128xf32>
    %cst_17 = arith.constant 0.000000e+00 : f32
    %23 = vector.broadcast %cst_17 : f32 to vector<56x128xf32>
    %24 = arith.maximumf %22, %23 : vector<56x128xf32>
    %c0_18 = arith.constant 0 : index
    %c0_19 = arith.constant 0 : index
    %25 = vector.load %arg8[%c0_18, %c0_19] : memref<128x128xbf16, #tpu.memory_space<vmem>>, vector<128x128xbf16>
    %c0_20 = arith.constant 0 : index
    %c0_21 = arith.constant 0 : index
    %26 = vector.load %arg9[%c0_20, %c0_21] : memref<1x128xf32, #tpu.memory_space<vmem>>, vector<1x128xf32>
    %27 = arith.truncf %24 : vector<56x128xf32> to vector<56x128xbf16>
    %cst_22 = arith.constant dense<0.000000e+00> : vector<56x128xf32>
    %28 = tpu.matmul %27, %25, %cst_22 {dimension_numbers = #tpu.dot_dimension_numbers<[1], [0], [0], [1], [0, 0, 1, 1], [], []>} : vector<56x128xbf16>, vector<128x128xbf16>, vector<56x128xf32> -> vector<56x128xf32>
    %29 = vector.broadcast %26 : vector<1x128xf32> to vector<56x128xf32>
    %30 = arith.addf %28, %29 : vector<56x128xf32>
    %cst_23 = arith.constant 0.000000e+00 : f32
    %31 = vector.broadcast %cst_23 : f32 to vector<56x128xf32>
    %32 = arith.maximumf %30, %31 : vector<56x128xf32>
    %c0_24 = arith.constant 0 : index
    %c0_25 = arith.constant 0 : index
    %33 = vector.load %arg10[%c0_24, %c0_25] : memref<128x128xbf16, #tpu.memory_space<vmem>>, vector<128x128xbf16>
    %c0_26 = arith.constant 0 : index
    %c0_27 = arith.constant 0 : index
    %34 = vector.load %arg11[%c0_26, %c0_27] : memref<1x128xf32, #tpu.memory_space<vmem>>, vector<1x128xf32>
    %35 = arith.truncf %32 : vector<56x128xf32> to vector<56x128xbf16>
    %cst_28 = arith.constant dense<0.000000e+00> : vector<56x128xf32>
    %36 = tpu.matmul %35, %33, %cst_28 {dimension_numbers = #tpu.dot_dimension_numbers<[1], [0], [0], [1], [0, 0, 1, 1], [], []>} : vector<56x128xbf16>, vector<128x128xbf16>, vector<56x128xf32> -> vector<56x128xf32>
    %37 = vector.broadcast %34 : vector<1x128xf32> to vector<56x128xf32>
    %38 = arith.addf %36, %37 : vector<56x128xf32>
    %39 = vector.extract_strided_slice %7 {offsets = [0, 128], sizes = [56, 128], strides = [1, 1]} : vector<56x256xf32> to vector<56x128xf32>
    %c0_29 = arith.constant 0 : index
    %c0_30 = arith.constant 0 : index
    %40 = vector.load %arg12[%c0_29, %c0_30] : memref<128x128xbf16, #tpu.memory_space<vmem>>, vector<128x128xbf16>
    %c0_31 = arith.constant 0 : index
    %c0_32 = arith.constant 0 : index
    %41 = vector.load %arg13[%c0_31, %c0_32] : memref<1x128xf32, #tpu.memory_space<vmem>>, vector<1x128xf32>
    %42 = arith.truncf %39 : vector<56x128xf32> to vector<56x128xbf16>
    %cst_33 = arith.constant dense<0.000000e+00> : vector<56x128xf32>
    %43 = tpu.matmul %42, %40, %cst_33 {dimension_numbers = #tpu.dot_dimension_numbers<[1], [0], [0], [1], [0, 0, 1, 1], [], []>} : vector<56x128xbf16>, vector<128x128xbf16>, vector<56x128xf32> -> vector<56x128xf32>
    %44 = vector.broadcast %41 : vector<1x128xf32> to vector<56x128xf32>
    %45 = arith.addf %43, %44 : vector<56x128xf32>
    %cst_34 = arith.constant 0.000000e+00 : f32
    %46 = vector.broadcast %cst_34 : f32 to vector<56x128xf32>
    %47 = arith.maximumf %45, %46 : vector<56x128xf32>
    %c0_35 = arith.constant 0 : index
    %c0_36 = arith.constant 0 : index
    %48 = vector.load %arg14[%c0_35, %c0_36] : memref<128x128xbf16, #tpu.memory_space<vmem>>, vector<128x128xbf16>
    %c0_37 = arith.constant 0 : index
    %c0_38 = arith.constant 0 : index
    %49 = vector.load %arg15[%c0_37, %c0_38] : memref<1x128xf32, #tpu.memory_space<vmem>>, vector<1x128xf32>
    %50 = arith.truncf %47 : vector<56x128xf32> to vector<56x128xbf16>
    %cst_39 = arith.constant dense<0.000000e+00> : vector<56x128xf32>
    %51 = tpu.matmul %50, %48, %cst_39 {dimension_numbers = #tpu.dot_dimension_numbers<[1], [0], [0], [1], [0, 0, 1, 1], [], []>} : vector<56x128xbf16>, vector<128x128xbf16>, vector<56x128xf32> -> vector<56x128xf32>
    %52 = vector.broadcast %49 : vector<1x128xf32> to vector<56x128xf32>
    %53 = arith.addf %51, %52 : vector<56x128xf32>
    %54 = arith.truncf %38 : vector<56x128xf32> to vector<56x128xbf16>
    %c0_40 = arith.constant 0 : index
    %c0_41 = arith.constant 0 : index
    %55 = vector.load %arg16[%c0_40, %c0_41] : memref<56x256xbf16, #tpu.memory_space<vmem>>, vector<56x128xbf16>
    tpu.vector_store %arg16[%c0_40, %c0_41], %54 {strides = array<i32>} : memref<56x256xbf16, #tpu.memory_space<vmem>>, vector<56x128xbf16>,
    %56 = arith.truncf %53 : vector<56x128xf32> to vector<56x128xbf16>
    %c0_42 = arith.constant 0 : index
    %c128 = arith.constant 128 : index
    %57 = vector.load %arg16[%c0_42, %c128] : memref<56x256xbf16, #tpu.memory_space<vmem>>, vector<56x128xbf16>
    tpu.vector_store %arg16[%c0_42, %c128], %56 {strides = array<i32>} : memref<56x256xbf16, #tpu.memory_space<vmem>>, vector<56x128xbf16>,
    return
  }
  func.func @transform_0(%arg0: i32) -> (i32, i32) {
    %c0_i32 = arith.constant 0 : i32
    %c0_i32_0 = arith.constant 0 : i32
    return %arg0, %c0_i32 : i32, i32
  }
  func.func @transform_1(%arg0: i32) -> (i32, i32) {
    %c0_i32 = arith.constant 0 : i32
    %c0_i32_0 = arith.constant 0 : i32
    %c0_i32_1 = arith.constant 0 : i32
    return %c0_i32, %c0_i32_0 : i32, i32
  }
  func.func @transform_2(%arg0: i32) -> (i32, i32) {
    %c0_i32 = arith.constant 0 : i32
    %c0_i32_0 = arith.constant 0 : i32
    %c0_i32_1 = arith.constant 0 : i32
    return %c0_i32, %c0_i32_0 : i32, i32
  }
  func.func @transform_3(%arg0: i32) -> (i32, i32) {
    %c0_i32 = arith.constant 0 : i32
    %c0_i32_0 = arith.constant 0 : i32
    %c0_i32_1 = arith.constant 0 : i32
    return %c0_i32, %c0_i32_0 : i32, i32
  }
  func.func @transform_4(%arg0: i32) -> (i32, i32) {
    %c0_i32 = arith.constant 0 : i32
    %c0_i32_0 = arith.constant 0 : i32
    %c0_i32_1 = arith.constant 0 : i32
    return %c0_i32, %c0_i32_0 : i32, i32
  }
  func.func @transform_5(%arg0: i32) -> (i32, i32) {
    %c0_i32 = arith.constant 0 : i32
    %c0_i32_0 = arith.constant 0 : i32
    %c0_i32_1 = arith.constant 0 : i32
    return %c0_i32, %c0_i32_0 : i32, i32
  }
  func.func @transform_6(%arg0: i32) -> (i32, i32) {
    %c0_i32 = arith.constant 0 : i32
    %c0_i32_0 = arith.constant 0 : i32
    %c0_i32_1 = arith.constant 0 : i32
    return %c0_i32, %c0_i32_0 : i32, i32
  }
  func.func @transform_7(%arg0: i32) -> (i32, i32) {
    %c0_i32 = arith.constant 0 : i32
    %c0_i32_0 = arith.constant 0 : i32
    %c0_i32_1 = arith.constant 0 : i32
    return %c0_i32, %c0_i32_0 : i32, i32
  }
  func.func @transform_8(%arg0: i32) -> (i32, i32) {
    %c0_i32 = arith.constant 0 : i32
    %c0_i32_0 = arith.constant 0 : i32
    %c0_i32_1 = arith.constant 0 : i32
    return %c0_i32, %c0_i32_0 : i32, i32
  }
  func.func @transform_9(%arg0: i32) -> (i32, i32) {
    %c0_i32 = arith.constant 0 : i32
    %c0_i32_0 = arith.constant 0 : i32
    %c0_i32_1 = arith.constant 0 : i32
    return %c0_i32, %c0_i32_0 : i32, i32
  }
  func.func @transform_10(%arg0: i32) -> (i32, i32) {
    %c0_i32 = arith.constant 0 : i32
    %c0_i32_0 = arith.constant 0 : i32
    %c0_i32_1 = arith.constant 0 : i32
    return %c0_i32, %c0_i32_0 : i32, i32
  }
  func.func @transform_11(%arg0: i32) -> (i32, i32) {
    %c0_i32 = arith.constant 0 : i32
    %c0_i32_0 = arith.constant 0 : i32
    %c0_i32_1 = arith.constant 0 : i32
    return %c0_i32, %c0_i32_0 : i32, i32
  }
  func.func @transform_12(%arg0: i32) -> (i32, i32) {
    %c0_i32 = arith.constant 0 : i32
    %c0_i32_0 = arith.constant 0 : i32
    %c0_i32_1 = arith.constant 0 : i32
    return %c0_i32, %c0_i32_0 : i32, i32
  }
  func.func @transform_13(%arg0: i32) -> (i32, i32) {
    %c0_i32 = arith.constant 0 : i32
    %c0_i32_0 = arith.constant 0 : i32
    %c0_i32_1 = arith.constant 0 : i32
    return %c0_i32, %c0_i32_0 : i32, i32
  }
  func.func @transform_14(%arg0: i32) -> (i32, i32) {
    %c0_i32 = arith.constant 0 : i32
    %c0_i32_0 = arith.constant 0 : i32
    %c0_i32_1 = arith.constant 0 : i32
    return %c0_i32, %c0_i32_0 : i32, i32
  }
  func.func @transform_15(%arg0: i32) -> (i32, i32) {
    %c0_i32 = arith.constant 0 : i32
    %c0_i32_0 = arith.constant 0 : i32
    return %arg0, %c0_i32 : i32, i32
  }
}

</mosaic_0001>

<bundles_post_ra>
// kernel: rnd_forward.1
= control target key start
LH: loop header
LB: loop body
LE: loop exit
PB: predicated region body
PF: predicated region fallthrough
CT: control target
= control target key end

     0   :  { %vm119_vm0 = vcmask 1043456   ;;  %v1518_v1 = vmov 0   ;;  %vm106_vm1 = vcmask 195584   ;;  %v63_v24 = vlaneseq  ;;  %s1852_s1 = inlined_call_operand.vmem [shape: bf16[24,256], index: 1, kind: input, shape index: {}]   ;;  %s1853_s0 = inlined_call_operand.vmem [shape: bf16[56,24], index: 0, kind: input, shape index: {}]   ;;  %s1854_s3 = inlined_call_operand.vmem [shape: bf16[128,128], index: 3, kind: input, shape index: {}]   ;;  %s1855_s5 = inlined_call_operand.vmem [shape: bf16[128,128], index: 5, kind: input, shape index: {}]   ;;  %s1856_s2 = inlined_call_operand.vmem [shape: f32[1,256], index: 2, kind: input, shape index: {}]   ;;  %s1857_s7 = inlined_call_operand.vmem [shape: bf16[128,128], index: 7, kind: input, shape index: {}]   ;;  %s1858_s4 = inlined_call_operand.vmem [shape: f32[1,128], index: 4, kind: input, shape index: {}]   ;;  %s1859_s11 = inlined_call_operand.vmem [shape: bf16[128,128], index: 11, kind: input, shape index: {}]   ;;  %s1860_s9 = inlined_call_operand.vmem [shape: bf16[128,128], index: 9, kind: input, shape index: {}]   ;;  %s1861_s6 = inlined_call_operand.vmem [shape: f32[1,128], index: 6, kind: input, shape index: {}]   ;;  %s1862_s13 = inlined_call_operand.vmem [shape: bf16[128,128], index: 13, kind: input, shape index: {}]   ;;  %s1863_s8 = inlined_call_operand.vmem [shape: f32[1,128], index: 8, kind: input, shape index: {}]   ;;  %s1864_s12 = inlined_call_operand.vmem [shape: f32[1,128], index: 12, kind: input, shape index: {}]   ;;  %s1865_s10 = inlined_call_operand.vmem [shape: f32[1,128], index: 10, kind: input, shape index: {}]   ;;  %s1866_s15 = inlined_call_operand.vmem [shape: bf16[56,256], index: 15, kind: output, shape index: {}]   ;;  %s1867_s14 = inlined_call_operand.vmem [shape: f32[1,128], index: 14, kind: input, shape index: {}]  }
   0x1   :  { %v60_v0 = vld [vmem:[%s1852_s1 + $0x10] sm:$0xff]  ;;  %158 = vmatprep.mubr.bf16.mxu0 %v1518_v1  ;;  %v1463_v4 = vld [vmem:[%s1852_s1 + $0x4] ss:$8 sps:$4 sm:$0xff]   ;;  %v1465_v6 = vld [vmem:[%s1852_s1] ss:$8 sps:$4 sm:$0xff]  }
   0x2   :  { %v1156_v2 = vcombine.high %v60_v0, %v60_v0  ;;  %v1155_v3 = vcombine.low %v60_v0, %v60_v0  ;;  %v1466_v7 = vld [vmem:[%s1853_s0] sm:$0xff]   ;;  %v1470_v8 = vld [vmem:[%s1854_s3 + $0x38] sm:$0xff]   ;;  %v1471_v9 = vld [vmem:[%s1854_s3 + $0x30] sm:$0xff]   ;;  %v64_v25 = vshrl.u32 %v63_v24, 7 }
   0x3   :  { %1316 = vmatprep.subr.bf16.mxu1 %v1470_v8  ;;  %v1472_v10 = vld [vmem:[%s1854_s3 + $0x28] sm:$0xff]   ;;  %v1473_v11 = vld [vmem:[%s1854_s3 + $0x20] sm:$0xff]   ;;  %v1468_v13 = vld [vmem:[%s1853_s0 + $0x10] sm:$0xff]  }
   0x4   :  { %1157 = vmatprep.subr.msk.bf16.mxu0 %vm119_vm0, %v1156_v2  ;;  %v121_v5 = vsel %vm119_vm0, %v1155_v3, 0  ;;  %1317 = vmatpush3.bf16.msra.mxu1 %v1470_v8  ;;  %v1467_v12 = vld [vmem:[%s1853_s0 + $0x8] sm:$0xff]   ;;  %v1469_v14 = vld [vmem:[%s1853_s0 + $0x18] ss:$0 sps:$4 sm:$0xff]   ;;  %v1475_v16 = vld [vmem:[%s1854_s3 + $0x10] sm:$0xff]   ;;  %v65_v26 = vsub.s32 0, %v64_v25 }
   0x5   :  { %139 = vmatpush1.bf16.msra.mxu0 %v121_v5  ;;  %1318 = vmatprep.subr.bf16.mxu1 %v1471_v9  ;;  %v1474_v15 = vld [vmem:[%s1854_s3 + $0x18] sm:$0xff]   ;;  %v1476_v17 = vld [vmem:[%s1854_s3 + $0x8] sm:$0xff]   ;;  %v1477_v18 = vld [vmem:[%s1854_s3] sm:$0xff]   ;;  %v69_v28 = vsub.s32 1, %v64_v25 }
   0x6   :  { %140 = vmatprep.subr.bf16.mxu0 %v1463_v4  ;;  %v1478_v19 = vld [vmem:[%s1855_s5 + $0x38] sm:$0xff]   ;;  %v1479_v20 = vld [vmem:[%s1855_s5 + $0x30] sm:$0xff]   ;;  %v1480_v21 = vld [vmem:[%s1855_s5 + $0x28] sm:$0xff]  }
   0x7   :  { %v1481_v22 = vld [vmem:[%s1855_s5 + $0x20] sm:$0xff]   ;;  %v1482_v23 = vld [vmem:[%s1855_s5 + $0x18] sm:$0xff]  }
   0x8   :  { %1319 = vmatpush3.bf16.msra.mxu1 %v1471_v9  ;;  %v61_v27 = vld [vmem:[%s1856_s2] sm:$0x3] }
   0x9   :  { %141 = vmatpush1.bf16.msra.mxu0 %v1465_v6  ;;  %1320 = vmatprep.subr.bf16.mxu1 %v1472_v10  ;;  %v66_v29 = vrot.slane %v61_v27, %v65_v26  ;;  %v1666_v31 = vrot.slane %v61_v27, %v69_v28  ;;  %v1162_v26 = vld [vmem:[%s1858_s4] ss:$0 sm:$0xff] }
   0xa   :  { %1340 = vmatprep.subr.bf16.mxu0 %v1478_v19 }
   0xc   :  { %1158 = vmatmul.mubr.msk.bf16.vlgmr.msra.gmra.mxu0 %vm106_vm1, %v1466_v7  ;;  %1321 = vmatpush3.bf16.msra.mxu1 %v1472_v10 }
   0xd   :  { %168 = vmatprep.mubr.bf16.mxu0 %v1518_v1  ;;  %1322 = vmatprep.subr.bf16.mxu1 %v1473_v11 }
   0xe   :  { %1341 = vmatpush3.bf16.msra.mxu0 %v1478_v19  ;;  %v1486_v19 = vld [vmem:[%s1857_s7 + $0x38] sm:$0xff]  }
   0xf   :  { %1342 = vmatprep.subr.bf16.mxu0 %v1479_v20 }
  0x10   :  { %1323 = vmatpush3.bf16.msra.mxu1 %v1473_v11 }
  0x11   :  { %1324 = vmatprep.subr.bf16.mxu1 %v1474_v15 }
  0x12   :  { %1343 = vmatpush3.bf16.msra.mxu0 %v1479_v20  ;;  %v1487_v20 = vld [vmem:[%s1857_s7 + $0x30] sm:$0xff]  }
  0x13   :  { %1344 = vmatprep.subr.bf16.mxu0 %v1480_v21 }
  0x14   :  { %1159 = vmatmul.mubr.msk.bf16.gmra.mxu0 %vm106_vm1, %v1467_v12  ;;  %1325 = vmatpush3.bf16.msra.mxu1 %v1474_v15 }
  0x15   :  { %178 = vmatprep.mubr.bf16.mxu0 %v1518_v1  ;;  %1326 = vmatprep.subr.bf16.mxu1 %v1475_v16 }
  0x16   :  { %1345 = vmatpush3.bf16.msra.mxu0 %v1480_v21  ;;  %v1488_v21 = vld [vmem:[%s1857_s7 + $0x28] sm:$0xff]  }
  0x17   :  { %1346 = vmatprep.subr.bf16.mxu0 %v1481_v22 }
  0x18   :  { %1327 = vmatpush3.bf16.msra.mxu1 %v1475_v16  ;;  %v1483_v16 = vld [vmem:[%s1855_s5 + $0x10] sm:$0xff]  }
  0x19   :  { %1328 = vmatprep.subr.bf16.mxu1 %v1476_v17 }
  0x1a   :  { %1347 = vmatpush3.bf16.msra.mxu0 %v1481_v22  ;;  %v1489_v22 = vld [vmem:[%s1857_s7 + $0x20] sm:$0xff]  }
  0x1b   :  { %1348 = vmatprep.subr.bf16.mxu0 %v1482_v23 }
  0x1c   :  { %1160 = vmatmul.mubr.msk.bf16.gmra.mxu0 %vm106_vm1, %v1468_v13  ;;  %1329 = vmatpush3.bf16.msra.mxu1 %v1476_v17  ;;  %v1484_v17 = vld [vmem:[%s1855_s5 + $0x8] sm:$0xff]  }
  0x1d   :  { %188 = vmatprep.mubr.bf16.mxu0 %v1518_v1  ;;  %1330 = vmatprep.subr.bf16.mxu1 %v1477_v18 }
  0x1e   :  { %1349 = vmatpush3.bf16.msra.mxu0 %v1482_v23  ;;  %v1490_v23 = vld [vmem:[%s1857_s7 + $0x18] sm:$0xff]  }
  0x1f   :  { %1350 = vmatprep.subr.bf16.mxu0 %v1483_v16 }
  0x20   :  { %1331 = vmatpush3.bf16.msra.mxu1 %v1477_v18  ;;  %v1485_v18 = vld [vmem:[%s1855_s5] sm:$0xff]  }
  0x21   :  { %1364 = vmatprep.subr.bf16.mxu1 %v1486_v19 }
  0x22   :  { %1351 = vmatpush3.bf16.msra.mxu0 %v1483_v16 }
  0x23   :  { %1352 = vmatprep.subr.bf16.mxu0 %v1484_v17 }
  0x24   :  { %1161 = vmatmul.mubr.msk.bf16.gmra.mxu0 %vm106_vm1, %v1469_v14 }
  0x26   :  { %1353 = vmatpush3.bf16.msra.mxu0 %v1484_v17  ;;  %v1495_v17 = vld [vmem:[%s1859_s11 + $0x30] sm:$0xff]  }
  0x27   :  { %1354 = vmatprep.subr.bf16.mxu0 %v1485_v18 }
  0x2a   :  { %1355 = vmatpush3.bf16.msra.mxu0 %v1485_v18 }
  0xcc   :  { %v160_v30 = vpop.f32.mrf.mxu0 }
  0xcd   :  { %v161_v33 = vadd.f32 %v160_v30, %v66_v29 }
  0xce   :  { %v162_v32 = vpop.f32.mrf.mxu0 }
  0xcf   :  { %v163_v35 = vadd.f32 %v162_v32, %v1666_v31  ;;  %v197_v38 = vmax.f32 %v161_v33, 0.0 }
  0xd0   :  { %v164_v34 = vpop.f32.mrf.mxu0 }
  0xd1   :  { %v165_v36 = vadd.f32 %v164_v34, %v66_v29  ;;  %v198_v42 = vmax.f32 %v163_v35, 0.0 }
  0xd2   :  { %v166_v37 = vpop.f32.mrf.mxu0 }
  0xd3   :  { %v199_v39 = vmax.f32 %v165_v36, 0.0  ;;  %v167_v40 = vadd.f32 %v166_v37, %v1666_v31 }
  0xd4   :  { %v170_v41 = vpop.f32.mrf.mxu0 }
  0xd5   :  { %v200_v43 = vmax.f32 %v167_v40, 0.0  ;;  %v228_v44 = vpack.c.bf16 %v199_v39, %v197_v38  ;;  %v171_v47 = vadd.f32 %v170_v41, %v66_v29 }
  0xd6   :  { %v172_v45 = vpop.f32.mrf.mxu0 }
  0xd7   :  { %v1670_v46 = vpack.c.bf16 %v200_v43, %v198_v42  ;;  %1332 = vmatprep.mubr.bf16.mxu1 %v228_v44  ;;  %v173_v49 = vadd.f32 %v172_v45, %v1666_v31  ;;  %v201_v52 = vmax.f32 %v171_v47, 0.0 }
  0xd8   :  { %v174_v48 = vpop.f32.mrf.mxu0 }
  0xd9   :  { %v175_v50 = vadd.f32 %v174_v48, %v66_v29  ;;  %v202_v56 = vmax.f32 %v173_v49, 0.0 }
  0xda   :  { %v176_v51 = vpop.f32.mrf.mxu0 }
  0xdb   :  { %v203_v53 = vmax.f32 %v175_v50, 0.0  ;;  %v177_v54 = vadd.f32 %v176_v51, %v1666_v31 }
  0xdc   :  { %v180_v55 = vpop.f32.mrf.mxu0 }
  0xdd   :  { %v229_v57 = vpack.c.bf16 %v203_v53, %v201_v52  ;;  %v204_v58 = vmax.f32 %v177_v54, 0.0  ;;  %v181_v59 = vadd.f32 %v180_v55, %v66_v29  ;;  %v1491_v53 = vld [vmem:[%s1857_s7 + $0x10] sm:$0xff]   ;;  %v1492_v54 = vld [vmem:[%s1857_s7 + $0x8] sm:$0xff]   ;;  %v1493_v55 = vld [vmem:[%s1857_s7] sm:$0xff]  }
  0xde   :  { %v182_v60 = vpop.f32.mrf.mxu0 }
  0xdf   :  { %v1674_v61 = vpack.c.bf16 %v204_v58, %v202_v56  ;;  %v183_v62 = vadd.f32 %v182_v60, %v1666_v31  ;;  %1333 = vmatmul.mubr.bf16.vlgmr.msra.gmra.mxu1 %v229_v57  ;;  %v205_v0 = vmax.f32 %v181_v59, 0.0  ;;  %v1494_v56 = vld [vmem:[%s1859_s11 + $0x38] sm:$0xff]   ;;  %v1503_v58 = vld [vmem:[%s1860_s9 + $0x30] sm:$0xff]   ;;  %v1504_v59 = vld [vmem:[%s1860_s9 + $0x28] sm:$0xff]  }
  0xe0   :  { %v184_v63 = vpop.f32.mrf.mxu0  ;;  %1365 = vmatpush3.bf16.msra.mxu1 %v1486_v19  ;;  %v1502_v57 = vld [vmem:[%s1860_s9 + $0x38] sm:$0xff]   ;;  %v1505_v60 = vld [vmem:[%s1860_s9 + $0x20] sm:$0xff]  }
  0xe1   :  { %v185_v1 = vadd.f32 %v184_v63, %v66_v29  ;;  %v206_v3 = vmax.f32 %v183_v62, 0.0  ;;  %1366 = vmatprep.subr.bf16.mxu1 %v1487_v20  ;;  %1388 = vmatprep.subr.bf16.mxu0 %v1502_v57  ;;  %v1506_v62 = vld [vmem:[%s1860_s9 + $0x18] sm:$0xff]  }
  0xe2   :  { %v186_v2 = vpop.f32.mrf.mxu0 }
  0xe3   :  { %v207_v4 = vmax.f32 %v185_v1, 0.0  ;;  %v187_v5 = vadd.f32 %v186_v2, %v1666_v31  ;;  %v1171_v1 = vld [vmem:[%s1861_s6] ss:$0 sm:$0xff] }
  0xe4   :  { %v190_v6 = vpop.f32.mrf.mxu0  ;;  %1367 = vmatpush3.bf16.msra.mxu1 %v1487_v20 }
  0xe5   :  { %v230_v7 = vpack.c.bf16 %v207_v4, %v205_v0  ;;  %v208_v8 = vmax.f32 %v187_v5, 0.0  ;;  %v191_v9 = vadd.f32 %v190_v6, %v66_v29  ;;  %1368 = vmatprep.subr.bf16.mxu1 %v1488_v21 }
  0xe6   :  { %v1678_v10 = vpop.f32.mrf.mxu0 }
  0xe7   :  { %v1680_v11 = vpack.c.bf16 %v208_v8, %v206_v3  ;;  %v209_v12 = vmax.f32 %v191_v9, 0.0  ;;  %1336 = vmatprep.mubr.bf16.mxu1 %v230_v7 }
  0xe8   :  { %v194_v13 = vpop.f32.mrf.mxu0  ;;  %1369 = vmatpush3.bf16.msra.mxu1 %v1488_v21  ;;  %v1496_v21 = vld [vmem:[%s1859_s11 + $0x28] sm:$0xff]  }
  0xe9   :  { %v231_v14 = vpack.c.bf16 %v209_v12, %v209_v12  ;;  %1370 = vmatprep.subr.bf16.mxu1 %v1489_v22 }
  0xea   :  { %v195_v15 = vpop.f32.mrf.mxu0 }
  0xeb   :  { %1337 = vmatmul.mubr.bf16.gmra.mxu1 %v231_v14 }
  0xec   :  { %1371 = vmatpush3.bf16.msra.mxu1 %v1489_v22 }
  0xed   :  { %1372 = vmatprep.subr.bf16.mxu1 %v1490_v23 }
  0xf0   :  { %1373 = vmatpush3.bf16.msra.mxu1 %v1490_v23 }
  0xf1   :  { %1374 = vmatprep.subr.bf16.mxu1 %v1491_v53 }
  0xf4   :  { %1375 = vmatpush3.bf16.msra.mxu1 %v1491_v53 }
  0xf5   :  { %1376 = vmatprep.subr.bf16.mxu1 %v1492_v54 }
  0xf8   :  { %1377 = vmatpush3.bf16.msra.mxu1 %v1492_v54 }
  0xf9   :  { %1378 = vmatprep.subr.bf16.mxu1 %v1493_v55 }
  0xfc   :  { %1379 = vmatpush3.bf16.msra.mxu1 %v1493_v55  ;;  %v1511_v55 = vld [vmem:[%s1862_s13 + $0x30] sm:$0xff]  }
  0xfd   :  { %1412 = vmatprep.subr.bf16.mxu1 %v1494_v56 }
 0x19f   :  { %v1334_v24 = vpop.f32.mrf.mxu1 }
 0x1a0   :  { %v329_v30 = vadd.f32 %v1334_v24, %v1162_v26 }
 0x1a1   :  { %v320_v25 = vpop.f32.mrf.mxu1 }
 0x1a2   :  { %v321_v28 = vadd.f32 %v1162_v26, %v320_v25  ;;  %v352_v37 = vmax.f32 %v329_v30, 0.0 }
 0x1a3   :  { %v1335_v27 = vpop.f32.mrf.mxu1 }
 0x1a4   :  { %v332_v29 = vadd.f32 %v1335_v27, %v1162_v26  ;;  %v350_v35 = vmax.f32 %v321_v28, 0.0 }
 0x1a5   :  { %v323_v32 = vpop.f32.mrf.mxu1 }
 0x1a6   :  { %v324_v33 = vadd.f32 %v1162_v26, %v323_v32  ;;  %v353_v34 = vmax.f32 %v332_v29, 0.0  ;;  %v1498_v32 = vld [vmem:[%s1859_s11 + $0x18] sm:$0xff]  }
 0x1a8   :  { %v351_v36 = vmax.f32 %v324_v33, 0.0  ;;  %v375_v39 = vpack.c.bf16 %v353_v34, %v352_v37  ;;  %v1499_v33 = vld [vmem:[%s1859_s11 + $0x10] sm:$0xff]   ;;  %v1500_v34 = vld [vmem:[%s1859_s11 + $0x8] sm:$0xff]  }
 0x1aa   :  { %v374_v38 = vpack.c.bf16 %v351_v36, %v350_v35  ;;  %v1501_v35 = vld [vmem:[%s1859_s11] sm:$0xff]  }
 0x1ab   :  { %v1338_v40 = vpop.f32.mrf.mxu1 }
 0x1ac   :  { %1356 = vmatprep.mubr.bf16.mxu0 %v374_v38  ;;  %v345_v41 = vadd.f32 %v1338_v40, %v1162_v26  ;;  %v1507_v38 = vld [vmem:[%s1860_s9 + $0x10] sm:$0xff]   ;;  %v1180_v40 = vld [vmem:[%s1863_s8] ss:$0 sm:$0xff] }
 0x1ad   :  { %v336_v42 = vpop.f32.mrf.mxu1  ;;  %1357 = vmatmul.mubr.bf16.vlgmr.msra.gmra.mxu0 %v375_v39  ;;  %v1508_v39 = vld [vmem:[%s1860_s9 + $0x8] sm:$0xff]  }
 0x1ae   :  { %v337_v43 = vadd.f32 %v1162_v26, %v336_v42  ;;  %v356_v45 = vmax.f32 %v345_v41, 0.0  ;;  %1389 = vmatpush3.bf16.msra.mxu0 %v1502_v57 }
 0x1af   :  { %v1339_v44 = vpop.f32.mrf.mxu1  ;;  %1390 = vmatprep.subr.bf16.mxu0 %v1503_v58 }
 0x1b0   :  { %v354_v48 = vmax.f32 %v337_v43, 0.0  ;;  %v377_v51 = vpack.c.bf16 %v356_v45, %v356_v45 }
 0x1b1   :  { %v339_v47 = vpop.f32.mrf.mxu1 }
 0x1b2   :  { %v340_v49 = vadd.f32 %v1162_v26, %v339_v47  ;;  %1391 = vmatpush3.bf16.msra.mxu0 %v1503_v58  ;;  %v1497_v26 = vld [vmem:[%s1859_s11 + $0x20] sm:$0xff]  }
 0x1b3   :  { %1392 = vmatprep.subr.bf16.mxu0 %v1504_v59 }
 0x1b4   :  { %v355_v50 = vmax.f32 %v340_v49, 0.0 }
 0x1b6   :  { %v376_v52 = vpack.c.bf16 %v355_v50, %v354_v48  ;;  %1393 = vmatpush3.bf16.msra.mxu0 %v1504_v59  ;;  %v1512_v59 = vld [vmem:[%s1862_s13 + $0x28] sm:$0xff]  }
 0x1b7   :  { %1394 = vmatprep.subr.bf16.mxu0 %v1505_v60 }
 0x1b8   :  { %1360 = vmatprep.mubr.bf16.mxu0 %v376_v52 }
 0x1b9   :  { %1361 = vmatmul.mubr.bf16.gmra.mxu0 %v377_v51 }
 0x1ba   :  { %1395 = vmatpush3.bf16.msra.mxu0 %v1505_v60 }
 0x1bb   :  { %1396 = vmatprep.subr.bf16.mxu0 %v1506_v62 }
 0x1be   :  { %1397 = vmatpush3.bf16.msra.mxu0 %v1506_v62 }
 0x1bf   :  { %1398 = vmatprep.subr.bf16.mxu0 %v1507_v38 }
 0x1c2   :  { %1399 = vmatpush3.bf16.msra.mxu0 %v1507_v38 }
 0x1c3   :  { %1400 = vmatprep.subr.bf16.mxu0 %v1508_v39 }
 0x1c6   :  { %1401 = vmatpush3.bf16.msra.mxu0 %v1508_v39  ;;  %v1189_v39 = vld [vmem:[%s1865_s10] ss:$0 sm:$0xff] }
 0x26d   :  { %v1358_v63 = vpop.f32.mrf.mxu0 }
 0x26e   :  { %v475_v5 = vadd.f32 %v1358_v63, %v1171_v1 }
 0x26f   :  { %v466_v0 = vpop.f32.mrf.mxu0 }
 0x270   :  { %v467_v3 = vadd.f32 %v1171_v1, %v466_v0  ;;  %v498_v13 = vmax.f32 %v475_v5, 0.0 }
 0x271   :  { %v1359_v2 = vpop.f32.mrf.mxu0 }
 0x272   :  { %v478_v4 = vadd.f32 %v1359_v2, %v1171_v1  ;;  %v496_v9 = vmax.f32 %v467_v3, 0.0 }
 0x273   :  { %v469_v6 = vpop.f32.mrf.mxu0 }
 0x274   :  { %v470_v7 = vadd.f32 %v1171_v1, %v469_v6  ;;  %v499_v8 = vmax.f32 %v478_v4, 0.0  ;;  %v1514_v6 = vld [vmem:[%s1862_s13 + $0x18] sm:$0xff]  }
 0x276   :  { %v497_v12 = vmax.f32 %v470_v7, 0.0  ;;  %v521_v15 = vpack.c.bf16 %v499_v8, %v498_v13  ;;  %v1515_v7 = vld [vmem:[%s1862_s13 + $0x10] sm:$0xff]   ;;  %v1198_v13 = vld [vmem:[%s1864_s12] ss:$0 sm:$0xff] }
 0x278   :  { %v520_v14 = vpack.c.bf16 %v497_v12, %v496_v9  ;;  %v1516_v9 = vld [vmem:[%s1862_s13 + $0x8] sm:$0xff]  }
 0x279   :  { %v1362_v16 = vpop.f32.mrf.mxu0 }
 0x27a   :  { %1380 = vmatprep.mubr.bf16.mxu1 %v520_v14  ;;  %v491_v19 = vadd.f32 %v1362_v16, %v1171_v1 }
 0x27b   :  { %v482_v18 = vpop.f32.mrf.mxu0  ;;  %1381 = vmatmul.mubr.bf16.vlgmr.msra.gmra.mxu1 %v521_v15  ;;  %v1517_v15 = vld [vmem:[%s1862_s13] sm:$0xff]  }
 0x27c   :  { %1413 = vmatpush3.bf16.msra.mxu1 %v1494_v56  ;;  %v483_v22 = vadd.f32 %v1171_v1, %v482_v18  ;;  %v502_v25 = vmax.f32 %v491_v19, 0.0 }
 0x27d   :  { %v1363_v20 = vpop.f32.mrf.mxu0  ;;  %1414 = vmatprep.subr.bf16.mxu1 %v1495_v17 }
 0x27e   :  { %v500_v27 = vmax.f32 %v483_v22, 0.0  ;;  %v523_v30 = vpack.c.bf16 %v502_v25, %v502_v25 }
 0x27f   :  { %v485_v23 = vpop.f32.mrf.mxu0 }
 0x280   :  { %v486_v24 = vadd.f32 %v1171_v1, %v485_v23  ;;  %1415 = vmatpush3.bf16.msra.mxu1 %v1495_v17  ;;  %v1513_v1 = vld [vmem:[%s1862_s13 + $0x20] sm:$0xff]  }
 0x281   :  { %1416 = vmatprep.subr.bf16.mxu1 %v1496_v21 }
 0x282   :  { %v501_v28 = vmax.f32 %v486_v24, 0.0 }
 0x284   :  { %v522_v29 = vpack.c.bf16 %v501_v28, %v500_v27  ;;  %1417 = vmatpush3.bf16.msra.mxu1 %v1496_v21 }
 0x285   :  { %1418 = vmatprep.subr.bf16.mxu1 %v1497_v26 }
 0x286   :  { %1384 = vmatprep.mubr.bf16.mxu1 %v522_v29 }
 0x287   :  { %1385 = vmatmul.mubr.bf16.gmra.mxu1 %v523_v30 }
 0x288   :  { %1419 = vmatpush3.bf16.msra.mxu1 %v1497_v26  ;;  %1428 = vmatprep.mubr.bf16.mxu1 %v1670_v46  ;;  %v193_v46 = vadd.f32 %v1678_v10, %v1666_v31  ;;  %v1509_v31 = vld [vmem:[%s1860_s9] sm:$0xff]  }
 0x289   :  { %1420 = vmatprep.subr.bf16.mxu1 %v1498_v32  ;;  %1402 = vmatprep.subr.bf16.mxu0 %v1509_v31 }
 0x28a   :  { %v210_v36 = vmax.f32 %v193_v46, 0.0  ;;  %1403 = vmatpush3.bf16.msra.mxu0 %v1509_v31 }
 0x28c   :  { %1421 = vmatpush3.bf16.msra.mxu1 %v1498_v32  ;;  %v808_v37 = vpack.c.bf16 %v210_v36, %v210_v36 }
 0x28d   :  { %1422 = vmatprep.subr.bf16.mxu1 %v1499_v33 }
 0x290   :  { %1423 = vmatpush3.bf16.msra.mxu1 %v1499_v33 }
 0x291   :  { %1424 = vmatprep.subr.bf16.mxu1 %v1500_v34 }
 0x294   :  { %1425 = vmatpush3.bf16.msra.mxu1 %v1500_v34 }
 0x295   :  { %1426 = vmatprep.subr.bf16.mxu1 %v1501_v35 }
 0x298   :  { %1427 = vmatpush3.bf16.msra.mxu1 %v1501_v35 }
 0x29b   :  { %1429 = vmatmul.mubr.bf16.vlgmr.msra.gmra.mxu1 %v1674_v61  ;;  %v1510_v61 = vld [vmem:[%s1862_s13 + $0x38] sm:$0xff]  }
 0x29c   :  { %1432 = vmatprep.mubr.bf16.mxu1 %v1680_v11  ;;  %1436 = vmatprep.subr.bf16.mxu0 %v1510_v61 }
 0x2a3   :  { %1433 = vmatmul.mubr.bf16.gmra.mxu1 %v808_v37 }
 0x33b   :  { %v1382_v10 = vpop.f32.mrf.mxu1 }
 0x33c   :  { %v621_v44 = vadd.f32 %v1382_v10, %v1180_v40 }
 0x33d   :  { %v612_v11 = vpop.f32.mrf.mxu1 }
 0x33e   :  { %v613_v42 = vadd.f32 %v1180_v40, %v612_v11  ;;  %v644_v51 = vmax.f32 %v621_v44, 0.0 }
 0x33f   :  { %v1383_v41 = vpop.f32.mrf.mxu1 }
 0x340   :  { %v624_v43 = vadd.f32 %v1383_v41, %v1180_v40  ;;  %v642_v49 = vmax.f32 %v613_v42, 0.0 }
 0x341   :  { %v615_v45 = vpop.f32.mrf.mxu1 }
 0x342   :  { %v616_v47 = vadd.f32 %v1180_v40, %v615_v45  ;;  %v645_v48 = vmax.f32 %v624_v43, 0.0 }
 0x344   :  { %v643_v50 = vmax.f32 %v616_v47, 0.0  ;;  %v667_v53 = vpack.c.bf16 %v645_v48, %v644_v51 }
 0x346   :  { %v666_v52 = vpack.c.bf16 %v643_v50, %v642_v49 }
 0x347   :  { %v1386_v54 = vpop.f32.mrf.mxu1 }
 0x348   :  { %1404 = vmatprep.mubr.bf16.mxu0 %v666_v52  ;;  %v637_v57 = vadd.f32 %v1386_v54, %v1180_v40 }
 0x349   :  { %v628_v56 = vpop.f32.mrf.mxu1  ;;  %1405 = vmatmul.mubr.bf16.vlgmr.msra.gmra.mxu0 %v667_v53 }
 0x34a   :  { %1437 = vmatpush3.bf16.msra.mxu0 %v1510_v61  ;;  %v629_v60 = vadd.f32 %v1180_v40, %v628_v56  ;;  %v648_v0 = vmax.f32 %v637_v57, 0.0 }
 0x34b   :  { %v1387_v58 = vpop.f32.mrf.mxu1  ;;  %1438 = vmatprep.subr.bf16.mxu0 %v1511_v55 }
 0x34c   :  { %v646_v2 = vmax.f32 %v629_v60, 0.0  ;;  %v669_v5 = vpack.c.bf16 %v648_v0, %v648_v0 }
 0x34d   :  { %v631_v62 = vpop.f32.mrf.mxu1 }
 0x34e   :  { %v632_v63 = vadd.f32 %v1180_v40, %v631_v62  ;;  %1439 = vmatpush3.bf16.msra.mxu0 %v1511_v55 }
 0x34f   :  { %1440 = vmatprep.subr.bf16.mxu0 %v1512_v59 }
 0x350   :  { %v647_v3 = vmax.f32 %v632_v63, 0.0 }
 0x352   :  { %v668_v4 = vpack.c.bf16 %v647_v3, %v646_v2  ;;  %1441 = vmatpush3.bf16.msra.mxu0 %v1512_v59  ;;  %v1207_v59 = vld [vmem:[%s1867_s14] ss:$0 sm:$0xff] }
 0x353   :  { %1442 = vmatprep.subr.bf16.mxu0 %v1513_v1 }
 0x354   :  { %1408 = vmatprep.mubr.bf16.mxu0 %v668_v4 }
 0x355   :  { %1409 = vmatmul.mubr.bf16.gmra.mxu0 %v669_v5 }
 0x356   :  { %1443 = vmatpush3.bf16.msra.mxu0 %v1513_v1 }
 0x357   :  { %1444 = vmatprep.subr.bf16.mxu0 %v1514_v6 }
 0x35a   :  { %1445 = vmatpush3.bf16.msra.mxu0 %v1514_v6 }
 0x35b   :  { %v1430_v8 = vpop.f32.mrf.mxu1  ;;  %1446 = vmatprep.subr.bf16.mxu0 %v1515_v7 }
 0x35c   :  { %v906_v18 = vadd.f32 %v1430_v8, %v1198_v13 }
 0x35d   :  { %v897_v12 = vpop.f32.mrf.mxu1 }
 0x35e   :  { %1447 = vmatpush3.bf16.msra.mxu0 %v1515_v7  ;;  %v898_v16 = vadd.f32 %v1198_v13, %v897_v12  ;;  %v929_v25 = vmax.f32 %v906_v18, 0.0 }
 0x35f   :  { %v1431_v14 = vpop.f32.mrf.mxu1  ;;  %1448 = vmatprep.subr.bf16.mxu0 %v1516_v9 }
 0x360   :  { %v909_v17 = vadd.f32 %v1431_v14, %v1198_v13  ;;  %v927_v23 = vmax.f32 %v898_v16, 0.0 }
 0x361   :  { %v900_v19 = vpop.f32.mrf.mxu1 }
 0x362   :  { %v901_v20 = vadd.f32 %v1198_v13, %v900_v19  ;;  %1449 = vmatpush3.bf16.msra.mxu0 %v1516_v9  ;;  %v930_v21 = vmax.f32 %v909_v17, 0.0 }
 0x363   :  { %v1434_v22 = vpop.f32.mrf.mxu1  ;;  %1450 = vmatprep.subr.bf16.mxu0 %v1517_v15 }
 0x364   :  { %v928_v24 = vmax.f32 %v901_v20, 0.0  ;;  %v952_v28 = vpack.c.bf16 %v930_v21, %v929_v25  ;;  %v922_v29 = vadd.f32 %v1434_v22, %v1198_v13 }
 0x365   :  { %v913_v26 = vpop.f32.mrf.mxu1 }
 0x366   :  { %v951_v27 = vpack.c.bf16 %v928_v24, %v927_v23  ;;  %1451 = vmatpush3.bf16.msra.mxu0 %v1517_v15  ;;  %v914_v32 = vadd.f32 %v1198_v13, %v913_v26  ;;  %v933_v35 = vmax.f32 %v922_v29, 0.0 }
 0x367   :  { %v1435_v30 = vpop.f32.mrf.mxu1 }
 0x368   :  { %1452 = vmatprep.mubr.bf16.mxu0 %v951_v27  ;;  %v931_v46 = vmax.f32 %v914_v32, 0.0  ;;  %v954_v38 = vpack.c.bf16 %v933_v35, %v933_v35 }
 0x369   :  { %v916_v33 = vpop.f32.mrf.mxu1  ;;  %1453 = vmatmul.mubr.bf16.vlgmr.msra.gmra.mxu0 %v952_v28 }
 0x36a   :  { %v917_v34 = vadd.f32 %v1198_v13, %v916_v33 }
 0x36c   :  { %v932_v36 = vmax.f32 %v917_v34, 0.0 }
 0x36e   :  { %v953_v37 = vpack.c.bf16 %v932_v36, %v931_v46 }
 0x370   :  { %1456 = vmatprep.mubr.bf16.mxu0 %v953_v37 }
 0x371   :  { %1457 = vmatmul.mubr.bf16.gmra.mxu0 %v954_v38 }
 0x409   :  { %v1406_v31 = vpop.f32.mrf.mxu0 }
 0x40a   :  { %v767_v61 = vadd.f32 %v1406_v31, %v1189_v39 }
 0x40b   :  { %v758_v10 = vpop.f32.mrf.mxu0 }
 0x40c   :  { %v1232_v11 = vpack.c.bf16 %v767_v61, %v767_v61  ;;  %v759_v40 = vadd.f32 %v1189_v39, %v758_v10 }
 0x40d   :  { %v1407_v41 = vpop.f32.mrf.mxu0 }
 0x40e   :  { %1104 = vst [vmem:[%s1866_s15 + $0x10] sm:$0xf] %v1232_v11  ;;  %v1230_v42 = vpack.c.bf16 %v759_v40, %v759_v40  ;;  %v770_v43 = vadd.f32 %v1407_v41, %v1189_v39 }
 0x40f   :  { %v761_v44 = vpop.f32.mrf.mxu0 }
 0x410   :  { %1102 = vst [vmem:[%s1866_s15] sm:$0xf] %v1230_v42  ;;  %v1233_v45 = vpack.c.bf16 %v770_v43, %v770_v43  ;;  %v762_v47 = vadd.f32 %v1189_v39, %v761_v44 }
 0x412   :  { %1105 = vst [vmem:[%s1866_s15 + $0x18] sm:$0xf] %v1233_v45  ;;  %v1231_v48 = vpack.c.bf16 %v762_v47, %v762_v47 }
 0x414   :  { %1103 = vst [vmem:[%s1866_s15 + $0x8] sm:$0xf] %v1231_v48 }
 0x415   :  { %v1410_v49 = vpop.f32.mrf.mxu0 }
 0x416   :  { %v783_v50 = vadd.f32 %v1410_v49, %v1189_v39 }
 0x417   :  { %v774_v51 = vpop.f32.mrf.mxu0 }
 0x418   :  { %v1236_v52 = vpack.c.bf16 %v783_v50, %v783_v50  ;;  %v775_v53 = vadd.f32 %v1189_v39, %v774_v51 }
 0x419   :  { %v1411_v54 = vpop.f32.mrf.mxu0 }
 0x41a   :  { %1108 = vst [vmem:[%s1866_s15 + $0x30] sm:$0xf] %v1236_v52  ;;  %v1234_v55 = vpack.c.bf16 %v775_v53, %v775_v53 }
 0x41b   :  { %v777_v56 = vpop.f32.mrf.mxu0 }
 0x41c   :  { %1106 = vst [vmem:[%s1866_s15 + $0x20] sm:$0xf] %v1234_v55  ;;  %v778_v57 = vadd.f32 %v1189_v39, %v777_v56 }
 0x41e   :  { %v1235_v58 = vpack.c.bf16 %v778_v57, %v778_v57 }
 0x420   :  { %1107 = vst [vmem:[%s1866_s15 + $0x28] sm:$0xf] %v1235_v58 }
 0x429   :  { %v1454_v60 = vpop.f32.mrf.mxu0 }
 0x42a   :  { %v1052_v62 = vadd.f32 %v1454_v60, %v1207_v59 }
 0x42b   :  { %v1043_v63 = vpop.f32.mrf.mxu0 }
 0x42c   :  { %v1239_v0 = vpack.c.bf16 %v1052_v62, %v1052_v62  ;;  %v1044_v1 = vadd.f32 %v1207_v59, %v1043_v63 }
 0x42d   :  { %v1455_v2 = vpop.f32.mrf.mxu0 }
 0x42e   :  { %1140 = vst [vmem:[%s1866_s15 + $0x14] sm:$0xf] %v1239_v0  ;;  %v1237_v3 = vpack.c.bf16 %v1044_v1, %v1044_v1  ;;  %v1055_v4 = vadd.f32 %v1455_v2, %v1207_v59 }
 0x42f   :  { %v1046_v5 = vpop.f32.mrf.mxu0 }
 0x430   :  { %1138 = vst [vmem:[%s1866_s15 + $0x4] sm:$0xf] %v1237_v3  ;;  %v1240_v6 = vpack.c.bf16 %v1055_v4, %v1055_v4  ;;  %v1047_v7 = vadd.f32 %v1207_v59, %v1046_v5 }
 0x431   :  { %v1458_v8 = vpop.f32.mrf.mxu0 }
 0x432   :  { %1141 = vst [vmem:[%s1866_s15 + $0x1c] sm:$0xf] %v1240_v6  ;;  %v1238_v9 = vpack.c.bf16 %v1047_v7, %v1047_v7  ;;  %v1068_v12 = vadd.f32 %v1458_v8, %v1207_v59 }
 0x433   :  { %v1059_v13 = vpop.f32.mrf.mxu0 }
 0x434   :  { %1139 = vst [vmem:[%s1866_s15 + $0xc] sm:$0xf] %v1238_v9  ;;  %v1243_v14 = vpack.c.bf16 %v1068_v12, %v1068_v12  ;;  %v1060_v15 = vadd.f32 %v1207_v59, %v1059_v13 }
 0x435   :  { %v1459_v16 = vpop.f32.mrf.mxu0 }
 0x436   :  { %1144 = vst [vmem:[%s1866_s15 + $0x34] sm:$0xf] %v1243_v14  ;;  %v1241_v17 = vpack.c.bf16 %v1060_v15, %v1060_v15 }
 0x437   :  { %v1062_v18 = vpop.f32.mrf.mxu0 }
 0x438   :  { %1142 = vst [vmem:[%s1866_s15 + $0x24] sm:$0xf] %v1241_v17  ;;  %v1063_v19 = vadd.f32 %v1207_v59, %v1062_v18 }
 0x43a   :  { %v1242_v20 = vpack.c.bf16 %v1063_v19, %v1063_v19 }
 0x43c   :  { %1143 = vst [vmem:[%s1866_s15 + $0x2c] sm:$0xf] %v1242_v20 }

</bundles_post_ra>
